<compile_context>
chip_gen: v7x
topology: tpu7x:2x2x1
jax: 0.10.0
libtpu: 0.0.40
codegen_flags: <defaults>
</compile_context>

<pallas_src>
import jax
import jax.numpy as jnp
from jax import lax
from jax.experimental import pallas as pl
from jax.experimental.pallas import tpu as pltpu


def _hazard_rnn_kernel(x_ref, win_ref, bin_ref, wout_ref, bout_ref, out_ref):
    # x_ref   : (S, Nt)   time-major inputs, batch on lanes
    # win_ref : (H, 1)    fc_input weight column (input_size == 1)
    # bin_ref : (H, 1)    fc_input bias column
    # wout_ref: (C, H)    fc_output weight (native PyTorch layout)
    # bout_ref: (C, 1)    fc_output bias column
    # out_ref : (C, Nt)   softmax(fc_output(h_last)), lane-dense
    S, Nt = x_ref.shape
    H = win_ref.shape[0]

    # Hoist loop-invariant broadcasts out of the serial recurrence
    # (JAX does not CSE broadcast_in_dim, so doing this per-step re-emits it).
    wb = jnp.broadcast_to(win_ref[...], (H, Nt))  # (H, Nt)
    bb = jnp.broadcast_to(bin_ref[...], (H, Nt))  # (H, Nt)

    def step(t, h):
        # (1, Nt) lane-dense row; sublane-broadcast happens in the multiply.
        x_t = x_ref[pl.ds(t, 1), :]
        # fc_input with input_size=1 is a broadcast multiply (VPU); the only
        # irreducible serial cost per step is the EUP tanh.
        return jnp.tanh(x_t * wb + bb + h)

    # h is re-initialized to zero inside the kernel for every grid tile, so no
    # state leaks between batch tiles.
    h0 = jnp.zeros((H, Nt), jnp.float32)
    unroll = True if S <= 32 else 8
    h = lax.fori_loop(0, S, step, h0, unroll=unroll)

    # Lane-dense epilogue: logits (C, Nt) = (C, H) @ (H, Nt); softmax over the
    # C (sublane) axis; divide via approx reciprocal on the otherwise-idle EUP.
    logits = (
        jnp.dot(wout_ref[...], h, preferred_element_type=jnp.float32)
        + bout_ref[...]
    )
    m = jnp.max(logits, axis=0, keepdims=True)
    e = jnp.exp(logits - m)
    denom = jnp.sum(e, axis=0, keepdims=True)
    out_ref[...] = (e * pl.reciprocal(denom, approx=True)).astype(out_ref.dtype)


def _pick_tile_n(n_pad, s, h):
    """Largest batch tile (multiple of 128) that divides n_pad and fits VMEM."""
    for nt in (512, 256, 128):
        if n_pad % nt != 0:
            continue
        # rough f32 footprint: 2x double-buffered x tiles + h + hoisted
        # W/b broadcasts (+ headroom for spills / out tiles)
        est_bytes = 4 * (2 * s * nt + 6 * h * nt)
        if est_bytes <= 12 * 1024 * 1024:
            return nt
    return 128


def hazard_rnn_forward(x, w_in, b_in, w_out, b_out):
    """Forward pass of HazardRNN (return_all=False).

    x     : (B, E, S, 1) float32
    w_in  : (H, 1)   fc_input.weight  (PyTorch layout)
    b_in  : (H,)     fc_input.bias
    w_out : (C, H)   fc_output.weight (PyTorch layout)
    b_out : (C,)     fc_output.bias
    returns (B*E, C) softmax probabilities of the last step.
    """
    B, E, S, last = x.shape
    assert last == 1
    H, I = w_in.shape
    assert I == 1, "forward's squeeze(-1)+view implies input_size == 1"
    C = w_out.shape[0]
    N = B * E

    N_pad = max(128, ((N + 127) // 128) * 128)
    Nt = _pick_tile_n(N_pad, S, H)

    # Relayout x ONCE into exactly the layout the kernel consumes:
    # time-major (S, N_pad) with batch on the lane axis.
    x_tm = x.astype(jnp.float32).reshape(N, S).T  # (S, N)
    if N_pad != N:
        x_tm = jnp.pad(x_tm, ((0, 0), (0, N_pad - N)))

    w_in_col = w_in.reshape(H, 1).astype(jnp.float32)
    b_in_col = b_in.reshape(H, 1).astype(jnp.float32)
    w_out_m = w_out.astype(jnp.float32)            # (C, H)
    b_out_col = b_out.reshape(C, 1).astype(jnp.float32)

    cost = pl.CostEstimate(
        flops=int(3 * N_pad * H * S + 2 * N_pad * H * C),
        transcendentals=int(N_pad * H * S + N_pad * C + N_pad),
        bytes_accessed=int(4 * (S * N_pad + 2 * H + C * H + C + C * N_pad)),
    )

    grid_spec = pltpu.PrefetchScalarGridSpec(
        num_scalar_prefetch=0,
        grid=(N_pad // Nt,),
        in_specs=[
            pl.BlockSpec((S, Nt), lambda i: (0, i)),   # x, lane-dense tiles
            pl.BlockSpec((H, 1), lambda i: (0, 0)),    # W_in column
            pl.BlockSpec((H, 1), lambda i: (0, 0)),    # b_in column
            pl.BlockSpec((C, H), lambda i: (0, 0)),    # W_out
            pl.BlockSpec((C, 1), lambda i: (0, 0)),    # b_out column
        ],
        out_specs=pl.BlockSpec((C, Nt), lambda i: (0, i)),
    )

    out_cn = pl.pallas_call(
        _hazard_rnn_kernel,
        out_shape=jax.ShapeDtypeStruct((C, N_pad), jnp.float32),
        grid_spec=grid_spec,
        compiler_params=pltpu.CompilerParams(
            dimension_semantics=("parallel",),      # batch tiles shard across TCs (v7x)
            vmem_limit_bytes=32 * 1024 * 1024,
        ),
        cost_estimate=cost,
    )(x_tm, w_in_col, b_in_col, w_out_m, b_out_col)

    # Drop padded columns, return in PyTorch's (N, C) orientation.
    return out_cn[:, :N].T


def _reference_forward(x, w_in, b_in, w_out, b_out):
    """Pure-JAX mirror of the PyTorch forward (return_all=False)."""
    B, E, S, _ = x.shape
    N = B * E
    H = w_in.shape[0]
    xs = x.reshape(N, S, 1).astype(jnp.float32)
    h = jnp.zeros((N, H), jnp.float32)
    for t in range(S):
        h = jnp.tanh(xs[:, t, :] @ w_in.T + b_in + h)
    logits = h @ w_out.T + b_out
    return jax.nn.softmax(logits, axis=-1)


if __name__ == "__main__":
    # Small shapes consistent with the module's forward; N = B*E = 320 exercises
    # both the multi-tile grid (grid=(3,)) and the lane-padding path (320 -> 384).
    batch, num_experiments, seq_len = 2, 160, 8
    input_size, hidden_size, num_bins = 1, 128, 2

    key = jax.random.PRNGKey(0)
    k_x, k_w1, k_b1, k_w2, k_b2 = jax.random.split(key, 5)

    x = jax.random.normal(
        k_x, (batch, num_experiments, seq_len, 1), dtype=jnp.float32
    )

    # Deterministic parameter init (PyTorch-Linear-style uniform bounds),
    # stored in PyTorch layouts: weight (out_features, in_features).
    bound1 = 1.0 / (input_size ** 0.5)
    bound2 = 1.0 / (hidden_size ** 0.5)
    w_in = jax.random.uniform(
        k_w1, (hidden_size, input_size), jnp.float32, -bound1, bound1
    )
    b_in = jax.random.uniform(k_b1, (hidden_size,), jnp.float32, -bound1, bound1)
    w_out = jax.random.uniform(
        k_w2, (num_bins, hidden_size), jnp.float32, -bound2, bound2
    )
    b_out = jax.random.uniform(k_b2, (num_bins,), jnp.float32, -bound2, bound2)

    out = hazard_rnn_forward(x, w_in, b_in, w_out, b_out)
    out = jax.block_until_ready(out)

    ref = _reference_forward(x, w_in, b_in, w_out, b_out)
    assert out.shape == (batch * num_experiments, num_bins)
    # Tolerance accounts for the approx-reciprocal softmax denominator.
    assert jnp.allclose(out, ref, atol=5e-3, rtol=5e-3), float(
        jnp.max(jnp.abs(out - ref))
    )

    # TODO(synk): return_all=True path (softmax over all per-step logits) not
    # emitted by this kernel; only the default last-step output is produced.
    print("KERNEL_OK")
</pallas_src>

<mosaic_0001>
module attributes {stable_mosaic.version = 11 : i64} {
  func.func @_hazard_rnn_kernel(%arg0: i32, %arg1: memref<8x128xf32, #tpu.memory_space<vmem>>, %arg2: memref<128x1xf32, #tpu.memory_space<vmem>>, %arg3: memref<128x1xf32, #tpu.memory_space<vmem>>, %arg4: memref<2x128xf32, #tpu.memory_space<vmem>>, %arg5: memref<2x1xf32, #tpu.memory_space<vmem>>, %arg6: memref<2x128xf32, #tpu.memory_space<vmem>>) attributes {dimension_semantics = [#tpu.dimension_semantics<parallel>], iteration_bounds = array<i64: 3>, scalar_prefetch = 0 : i64, scratch_operands = 0 : i64, tpu.core_type = #tpu.core_type<tc>, window_params = [{transform_indices = @transform_0, window_bounds = array<i64: 8, 128>}, {pipeline_mode = #tpu.pipeline_mode<synchronous>, transform_indices = @transform_1, window_bounds = array<i64: 128, 1>}, {pipeline_mode = #tpu.pipeline_mode<synchronous>, transform_indices = @transform_2, window_bounds = array<i64: 128, 1>}, {pipeline_mode = #tpu.pipeline_mode<synchronous>, transform_indices = @transform_3, window_bounds = array<i64: 2, 128>}, {pipeline_mode = #tpu.pipeline_mode<synchronous>, transform_indices = @transform_4, window_bounds = array<i64: 2, 1>}, {transform_indices = @transform_5, window_bounds = array<i64: 2, 128>}]} {
    %c0 = arith.constant 0 : index
    %c0_0 = arith.constant 0 : index
    %0 = vector.load %arg2[%c0, %c0_0] : memref<128x1xf32, #tpu.memory_space<vmem>>, vector<128x1xf32>
    %1 = vector.shape_cast %0 : vector<128x1xf32> to vector<128x1xf32>
    %2 = vector.broadcast %1 : vector<128x1xf32> to vector<128x128xf32>
    %c0_1 = arith.constant 0 : index
    %c0_2 = arith.constant 0 : index
    %3 = vector.load %arg3[%c0_1, %c0_2] : memref<128x1xf32, #tpu.memory_space<vmem>>, vector<128x1xf32>
    %4 = vector.shape_cast %3 : vector<128x1xf32> to vector<128x1xf32>
    %5 = vector.broadcast %4 : vector<128x1xf32> to vector<128x128xf32>
    %cst = arith.constant 0.000000e+00 : f32
    %6 = vector.broadcast %cst : f32 to vector<128x128xf32>
    %c0_i32 = arith.constant 0 : i32
    %7 = arith.index_cast %c0_i32 : i32 to index
    %c0_3 = arith.constant 0 : index
    %8 = vector.load %arg1[%7, %c0_3] : memref<8x128xf32, #tpu.memory_space<vmem>>, vector<1x128xf32>
    %9 = vector.broadcast %8 : vector<1x128xf32> to vector<128x128xf32>
    %10 = arith.mulf %9, %2 : vector<128x128xf32>
    %11 = arith.addf %10, %5 : vector<128x128xf32>
    %12 = arith.addf %11, %6 : vector<128x128xf32>
    %13 = math.tanh %12 : vector<128x128xf32>
    %c1_i32 = arith.constant 1 : i32
    %14 = arith.index_cast %c1_i32 : i32 to index
    %c0_4 = arith.constant 0 : index
    %15 = vector.load %arg1[%14, %c0_4] : memref<8x128xf32, #tpu.memory_space<vmem>>, vector<1x128xf32>
    %16 = vector.broadcast %15 : vector<1x128xf32> to vector<128x128xf32>
    %17 = arith.mulf %16, %2 : vector<128x128xf32>
    %18 = arith.addf %17, %5 : vector<128x128xf32>
    %19 = arith.addf %18, %13 : vector<128x128xf32>
    %20 = math.tanh %19 : vector<128x128xf32>
    %c2_i32 = arith.constant 2 : i32
    %21 = arith.index_cast %c2_i32 : i32 to index
    %c0_5 = arith.constant 0 : index
    %22 = vector.load %arg1[%21, %c0_5] : memref<8x128xf32, #tpu.memory_space<vmem>>, vector<1x128xf32>
    %23 = vector.broadcast %22 : vector<1x128xf32> to vector<128x128xf32>
    %24 = arith.mulf %23, %2 : vector<128x128xf32>
    %25 = arith.addf %24, %5 : vector<128x128xf32>
    %26 = arith.addf %25, %20 : vector<128x128xf32>
    %27 = math.tanh %26 : vector<128x128xf32>
    %c3_i32 = arith.constant 3 : i32
    %28 = arith.index_cast %c3_i32 : i32 to index
    %c0_6 = arith.constant 0 : index
    %29 = vector.load %arg1[%28, %c0_6] : memref<8x128xf32, #tpu.memory_space<vmem>>, vector<1x128xf32>
    %30 = vector.broadcast %29 : vector<1x128xf32> to vector<128x128xf32>
    %31 = arith.mulf %30, %2 : vector<128x128xf32>
    %32 = arith.addf %31, %5 : vector<128x128xf32>
    %33 = arith.addf %32, %27 : vector<128x128xf32>
    %34 = math.tanh %33 : vector<128x128xf32>
    %c4_i32 = arith.constant 4 : i32
    %35 = arith.index_cast %c4_i32 : i32 to index
    %c0_7 = arith.constant 0 : index
    %36 = vector.load %arg1[%35, %c0_7] : memref<8x128xf32, #tpu.memory_space<vmem>>, vector<1x128xf32>
    %37 = vector.broadcast %36 : vector<1x128xf32> to vector<128x128xf32>
    %38 = arith.mulf %37, %2 : vector<128x128xf32>
    %39 = arith.addf %38, %5 : vector<128x128xf32>
    %40 = arith.addf %39, %34 : vector<128x128xf32>
    %41 = math.tanh %40 : vector<128x128xf32>
    %c5_i32 = arith.constant 5 : i32
    %42 = arith.index_cast %c5_i32 : i32 to index
    %c0_8 = arith.constant 0 : index
    %43 = vector.load %arg1[%42, %c0_8] : memref<8x128xf32, #tpu.memory_space<vmem>>, vector<1x128xf32>
    %44 = vector.broadcast %43 : vector<1x128xf32> to vector<128x128xf32>
    %45 = arith.mulf %44, %2 : vector<128x128xf32>
    %46 = arith.addf %45, %5 : vector<128x128xf32>
    %47 = arith.addf %46, %41 : vector<128x128xf32>
    %48 = math.tanh %47 : vector<128x128xf32>
    %c6_i32 = arith.constant 6 : i32
    %49 = arith.index_cast %c6_i32 : i32 to index
    %c0_9 = arith.constant 0 : index
    %50 = vector.load %arg1[%49, %c0_9] : memref<8x128xf32, #tpu.memory_space<vmem>>, vector<1x128xf32>
    %51 = vector.broadcast %50 : vector<1x128xf32> to vector<128x128xf32>
    %52 = arith.mulf %51, %2 : vector<128x128xf32>
    %53 = arith.addf %52, %5 : vector<128x128xf32>
    %54 = arith.addf %53, %48 : vector<128x128xf32>
    %55 = math.tanh %54 : vector<128x128xf32>
    %c7_i32 = arith.constant 7 : i32
    %56 = arith.index_cast %c7_i32 : i32 to index
    %c0_10 = arith.constant 0 : index
    %57 = vector.load %arg1[%56, %c0_10] : memref<8x128xf32, #tpu.memory_space<vmem>>, vector<1x128xf32>
    %58 = vector.broadcast %57 : vector<1x128xf32> to vector<128x128xf32>
    %59 = arith.mulf %58, %2 : vector<128x128xf32>
    %60 = arith.addf %59, %5 : vector<128x128xf32>
    %61 = arith.addf %60, %55 : vector<128x128xf32>
    %62 = math.tanh %61 : vector<128x128xf32>
    %c8_i32 = arith.constant 8 : i32
    %c0_11 = arith.constant 0 : index
    %c0_12 = arith.constant 0 : index
    %63 = vector.load %arg4[%c0_11, %c0_12] : memref<2x128xf32, #tpu.memory_space<vmem>>, vector<2x128xf32>
    %cst_13 = arith.constant dense<0.000000e+00> : vector<2x128xf32>
    %64 = tpu.matmul %63, %62, %cst_13 {dimension_numbers = #tpu.dot_dimension_numbers<[1], [0], [0], [1], [0, 0, 1, 1], [], []>} : vector<2x128xf32>, vector<128x128xf32>, vector<2x128xf32> -> vector<2x128xf32>
    %c0_14 = arith.constant 0 : index
    %c0_15 = arith.constant 0 : index
    %65 = vector.load %arg5[%c0_14, %c0_15] : memref<2x1xf32, #tpu.memory_space<vmem>>, vector<2x1xf32>
    %66 = vector.broadcast %65 : vector<2x1xf32> to vector<2x128xf32>
    %67 = arith.addf %64, %66 : vector<2x128xf32>
    %cst_16 = arith.constant dense<0xFF800000> : vector<128xf32>
    %68 = vector.multi_reduction <maximumf>, %67, %cst_16 [0] : vector<2x128xf32> to vector<128xf32>
    %69 = vector.shape_cast %68 : vector<128xf32> to vector<1x128xf32>
    %70 = vector.broadcast %69 : vector<1x128xf32> to vector<2x128xf32>
    %71 = arith.subf %67, %70 : vector<2x128xf32>
    %72 = math.exp %71 : vector<2x128xf32>
    %cst_17 = arith.constant dense<0.000000e+00> : vector<128xf32>
    %73 = vector.multi_reduction <add>, %72, %cst_17 [0] : vector<2x128xf32> to vector<128xf32>
    %74 = vector.shape_cast %73 : vector<128xf32> to vector<1x128xf32>
    %75 = tpu.reciprocal %74 {approx = true} : vector<1x128xf32> -> vector<1x128xf32>
    %76 = vector.broadcast %75 : vector<1x128xf32> to vector<2x128xf32>
    %77 = arith.mulf %72, %76 : vector<2x128xf32>
    %c0_18 = arith.constant 0 : index
    %c0_19 = arith.constant 0 : index
    %78 = vector.load %arg6[%c0_18, %c0_19] : memref<2x128xf32, #tpu.memory_space<vmem>>, vector<2x128xf32>
    tpu.vector_store %arg6[%c0_18, %c0_19], %77 {strides = array<i32>} : memref<2x128xf32, #tpu.memory_space<vmem>>, vector<2x128xf32>,
    return
  }
  func.func @transform_0(%arg0: i32) -> (i32, i32) {
    %c0_i32 = arith.constant 0 : i32
    %c0_i32_0 = arith.constant 0 : i32
    return %c0_i32, %arg0 : i32, i32
  }
  func.func @transform_1(%arg0: i32) -> (i32, i32) {
    %c0_i32 = arith.constant 0 : i32
    %c0_i32_0 = arith.constant 0 : i32
    %c0_i32_1 = arith.constant 0 : i32
    return %c0_i32, %c0_i32_0 : i32, i32
  }
  func.func @transform_2(%arg0: i32) -> (i32, i32) {
    %c0_i32 = arith.constant 0 : i32
    %c0_i32_0 = arith.constant 0 : i32
    %c0_i32_1 = arith.constant 0 : i32
    return %c0_i32, %c0_i32_0 : i32, i32
  }
  func.func @transform_3(%arg0: i32) -> (i32, i32) {
    %c0_i32 = arith.constant 0 : i32
    %c0_i32_0 = arith.constant 0 : i32
    %c0_i32_1 = arith.constant 0 : i32
    return %c0_i32, %c0_i32_0 : i32, i32
  }
  func.func @transform_4(%arg0: i32) -> (i32, i32) {
    %c0_i32 = arith.constant 0 : i32
    %c0_i32_0 = arith.constant 0 : i32
    %c0_i32_1 = arith.constant 0 : i32
    return %c0_i32, %c0_i32_0 : i32, i32
  }
  func.func @transform_5(%arg0: i32) -> (i32, i32) {
    %c0_i32 = arith.constant 0 : i32
    %c0_i32_0 = arith.constant 0 : i32
    return %c0_i32, %arg0 : i32, i32
  }
}

</mosaic_0001>

<bundles_post_ra>
// kernel: tpu_custom_call.1
= control target key start
LH: loop header
LB: loop body
LE: loop exit
PB: predicated region body
PF: predicated region fallthrough
CT: control target
= control target key end

     0   :  { %10 = vsyncpa [#allocation3], 0  ;;  %s2474_s0 = inlined_call_operand.vmem [shape: f32[8,384], index: 0, kind: input, shape index: {}]   ;;  %s2475_s1 = inlined_call_operand.vmem [shape: f32[128,1], index: 1, kind: input, shape index: {}]   ;;  %s2476_s2 = inlined_call_operand.vmem [shape: f32[128,1], index: 2, kind: input, shape index: {}]   ;;  %s2477_s3 = inlined_call_operand.vmem [shape: f32[2,128], index: 3, kind: input, shape index: {}]   ;;  %s2478_s4 = inlined_call_operand.vmem [shape: f32[2,1], index: 4, kind: input, shape index: {}]   ;;  %s2479_s5 = inlined_call_operand.hbm [shape: f32[2,384], index: 5, kind: output, shape index: {}]  }
   0x1   :  { %12 = vsyncpa [#allocation3 + $0x1], 0  ;;  %s1637_s18 = smov 0   ;;  %s1639_s19 = smov 0  }
   0x2   :  { %s1641_s20 = smov 0   ;;  %s1643_s21 = smov 0  }
   0x3 LB: > { %s1658_s22 = sadd.s32 4294967295, %s1600_s21   ;;  %s1135_s23 = sadd.s32 4294967294, %s1600_s21   ;;  %s1600_s21 = sphi %s1643_s21, %s2526_s21   ;;  %s1596_s20 = sphi %s1641_s20, %s2525_s20   ;;  %s1592_s19 = sphi %s1639_s19, %s2524_s19   ;;  %s1588_s18 = sphi %s1637_s18, %s2523_s18  }
   0x4   : > { %s1662_s24 = sadd.s32 1, %s1600_s21   ;;  %s135_s25 = sadd.s32 1, %s1596_s20 }
   0x5   : > { %s132_s26 = ssub.s32 %s1600_s21, %s1662_s24  ;;  %p145_p0 = scmp.ne.s32.totalorder %s1596_s20, %s1592_s19 }
   0x6   : > { %p133_p1 = scmp.eq.s32.totalorder %s132_s26, 0  ;;  %p146_p2 = scmp.eq.s32.totalorder %s1658_s22, 2 }
   0x7   : > { %p151_p3 = scmp.ne.s32.totalorder %s1592_s19, %s1588_s18  ;;  %p152_p4 = scmp.eq.s32.totalorder %s1135_s23, 2 }
   0x8   : > { %s1673_s27 = scalar_select %p133_p1, %s1596_s20, %s135_s25  }
   0x9   : > { %p1675_p5 = por %p146_p2, %p145_p0  ;;  %p1679_p6 = por %p152_p4, %p151_p3 }
   0xa   : > { %p1138_p7 = scmp.ge.s32.totalorder %s1600_s21, 1  ;;  %p189_p8 = scmp.lt.s32.totalorder %s1600_s21, 4 }
   0xc   : > { %p190_p9 = pnand %p1138_p7, %p189_p8 }
   0xe   : > { %193 = sbr.rel (%p190_p9) target bundleno = 645 (0x285), region = 40 }
  0x15   : > { %v316_v0 = vld [vmem:[%s2476_s2] sm:$0xff]  ;;  %v1602_v2 = vmov 0   ;;  %v317_v3 = vld [vmem:[%s2476_s2 + $0x8] sm:$0xff]  ;;  %v223_v5 = vld [vmem:[%s2475_s1 + $0x18] sm:$0xff]  ;;  %p216_p10 = scmp.lt.s32.totalorder %s1658_s22, 2  ;;  %vm1604_vm0 = vmmov 0  }
  0x16   : > { %v220_v1 = vld [vmem:[%s2475_s1] sm:$0xff]  ;;  %1273 = vset.pattern.permute.xlu1 %v1602_v2  ;;  %1272 = vset.pattern.permute.xlu0 %v1602_v2  ;;  %v221_v4 = vld [vmem:[%s2475_s1 + $0x8] sm:$0xff]  ;;  %v222_v6 = vld [vmem:[%s2475_s1 + $0x10] sm:$0xff]  ;;  %vm1041_vm1 = vcmask 1041408   ;;  %s213_s14 = sand.u32 1, %s1592_s19   ;;  %s1150_s16 = sshll.u32 %s1658_s22, 5 }
  0x17   : > { %334 = vperm.xlu1 %1273, %v316_v0   ;;  %238 = vperm.xlu0 %1272, %v220_v1   ;;  %v319_v7 = vld [vmem:[%s2476_s2 + $0x18] sm:$0xff]  ;;  %v318_v8 = vld [vmem:[%s2476_s2 + $0x10] sm:$0xff]  ;;  %v225_v9 = vld [vmem:[%s2475_s1 + $0x28] sm:$0xff]  ;;  %s217_s7 = scalar_select %p216_p10, %s1658_s22, 2 }
  0x18   : > { %v224_v10 = vld [vmem:[%s2475_s1 + $0x20] sm:$0xff]  ;;  %v321_v11 = vld [vmem:[%s2476_s2 + $0x28] sm:$0xff]  ;;  %v227_v13 = vld [vmem:[%s2475_s1 + $0x38] sm:$0xff]  ;;  %s1139_s15 = sshll.u32 %s213_s14, 1  ;;  %s2432_s30 = scalar_lea.hbm %s2479_s5, %s1150_s16 }
  0x19   : > { %v320_v12 = vld [vmem:[%s2476_s2 + $0x20] sm:$0xff]  ;;  %v226_v14 = vld [vmem:[%s2475_s1 + $0x30] sm:$0xff]  ;;  %v323_v15 = vld [vmem:[%s2476_s2 + $0x38] sm:$0xff]  ;;  %s1140_s8 = sshll.u32 %s217_s7, 3  ;;  %s215_s17 = scalar_lea.vmem [#allocation2], %s1139_s15 }
  0x1a   : > { %v322_v16 = vld [vmem:[%s2476_s2 + $0x30] sm:$0xff]  ;;  %v229_v17 = vld [vmem:[%s2475_s1 + $0x48] sm:$0xff]  ;;  %v228_v18 = vld [vmem:[%s2475_s1 + $0x40] sm:$0xff]  ;;  %s1789_s11 = scalar_lea.vmem %s2474_s0, %s1140_s8  ;;  %s1076_s23 = sshll.u32 %s215_s17, 4  ;;  %s2434_s23 = int_to_ptr.vmem [resolvable:$true] %s1076_s23 }
  0x1b   : > { %339 = vperm.xlu1 %1273, %v317_v3   ;;  %243 = vperm.xlu0 %1272, %v221_v4   ;;  %v325_v19 = vld [vmem:[%s2476_s2 + $0x48] sm:$0xff]  ;;  %v324_v20 = vld [vmem:[%s2476_s2 + $0x40] sm:$0xff]  ;;  %v231_v21 = vld [vmem:[%s2475_s1 + $0x58] sm:$0xff]  ;;  %s1063_s6 = scalar_lea.sflag [#allocation3], %s213_s14  ;;  %s1538_s7 = scalar_lea.vmem %s2434_s23, 32 }
  0x1c   : > { %v230_v22 = vld [vmem:[%s2475_s1 + $0x50] sm:$0xff]  ;;  %v327_v23 = vld [vmem:[%s2476_s2 + $0x58] sm:$0xff]  ;;  %v233_v25 = vld [vmem:[%s2475_s1 + $0x68] sm:$0xff]  ;;  %p1539_p11 = scmp.ne.s32.totalorder %s2434_s23, %s1538_s7  ;;  %s1606_s22 = smov [#allocation2]  }
  0x1d   : > { %v326_v24 = vld [vmem:[%s2476_s2 + $0x50] sm:$0xff]  ;;  %v232_v26 = vld [vmem:[%s2475_s1 + $0x60] sm:$0xff]  ;;  %v329_v27 = vld [vmem:[%s2476_s2 + $0x68] sm:$0xff]  ;;  %s1542_s8 = sshll.u32 %s1606_s22, 4  ;;  %s1543_s8 = int_to_ptr.vmem [resolvable:$false] %s1542_s8 }
  0x1e   : > { %v328_v28 = vld [vmem:[%s2476_s2 + $0x60] sm:$0xff]  ;;  %v235_v29 = vld [vmem:[%s2475_s1 + $0x78] sm:$0xff]  ;;  %v234_v30 = vld [vmem:[%s2475_s1 + $0x70] sm:$0xff]  ;;  %p1540_p12 = pnand %p1539_p11, %p1675_p5  ;;  %s1544_s9 = scalar_lea.vmem %s1543_s8, 64 }
  0x1f   : > { %253 = vperm.xlu1 %1273, %v223_v5   ;;  %248 = vperm.xlu0 %1272, %v222_v6   ;;  %v331_v31 = vld [vmem:[%s2476_s2 + $0x78] sm:$0xff]  ;;  %v330_v32 = vld [vmem:[%s2476_s2 + $0x70] sm:$0xff]  ;;  %v965_v33 = vld [vmem:[%s2478_s4] sm:$0x3]  ;;  %p1545_p0 = scmp.lt.s32.totalorder %s2434_s23, %s1543_s8  ;;  %p1546_p1 = scmp.lt.s32.totalorder %s1544_s9, %s1538_s7 }
  0x20   : > { %v1792_v34 = vld [vmem:[%s1789_s11] ss:$0 sm:$0xff]  ;;  %v1795_v35 = vld [vmem:[%s1789_s11 + $0x4] ss:$0 sm:$0xff]  ;;  %v1798_v36 = vld [vmem:[%s1789_s11 + $0x5] ss:$0 sm:$0xff]  ;;  %p1541_p13 = pneg %p1540_p12 }
  0x21   : > { %v1801_v37 = vld [vmem:[%s1789_s11 + $0x6] ss:$0 sm:$0xff]  ;;  %v1804_v38 = vld [vmem:[%s1789_s11 + $0x7] ss:$0 sm:$0xff]  ;;  %v1833_v57 = vld [vmem:[%s1789_s11 + $0x1] ss:$0 sm:$0xff]  ;;  %p1547_p2 = por %p1546_p1, %p1545_p0 }
  0x23   : > { %349 = vperm.xlu1 %1273, %v319_v7   ;;  %344 = vperm.xlu0 %1272, %v318_v8   ;;  %p1548_p3 = pnand %p1547_p2, %p1541_p13 }
  0x27   : > { %263 = vperm.xlu1 %1273, %v225_v9   ;;  %258 = vperm.xlu0 %1272, %v224_v10  }
  0x2b   : > { %359 = vperm.xlu1 %1273, %v321_v11   ;;  %354 = vperm.xlu0 %1272, %v320_v12  }
  0x2f   : > { %273 = vperm.xlu1 %1273, %v227_v13   ;;  %268 = vperm.xlu0 %1272, %v226_v14  }
  0x33   : > { %369 = vperm.xlu1 %1273, %v323_v15   ;;  %364 = vperm.xlu0 %1272, %v322_v16  }
  0x37   : > { %283 = vperm.xlu1 %1273, %v229_v17   ;;  %278 = vperm.xlu0 %1272, %v228_v18   ;;  %v1872_v17 = vld [vmem:[%s1789_s11 + $0x2] ss:$0 sm:$0xff] }
  0x3b   : > { %379 = vperm.xlu1 %1273, %v325_v19   ;;  %374 = vperm.xlu0 %1272, %v324_v20   ;;  %v1877_v19 = vld [vmem:[%s1789_s11 + $0x3] ss:$0 sm:$0xff] }
  0x3f   : > { %293 = vperm.xlu1 %1273, %v231_v21   ;;  %288 = vperm.xlu0 %1272, %v230_v22  }
  0x43   : > { %389 = vperm.xlu1 %1273, %v327_v23   ;;  %384 = vperm.xlu0 %1272, %v326_v24  }
  0x47   : > { %303 = vperm.xlu1 %1273, %v233_v25   ;;  %298 = vperm.xlu0 %1272, %v232_v26  }
  0x4b   : > { %399 = vperm.xlu1 %1273, %v329_v27   ;;  %394 = vperm.xlu0 %1272, %v328_v28  }
  0x4f   : > { %313 = vperm.xlu1 %1273, %v235_v29   ;;  %308 = vperm.xlu0 %1272, %v234_v30  }
  0x53   : > { %409 = vperm.xlu1 %1273, %v331_v31   ;;  %404 = vperm.xlu0 %1272, %v330_v32  }
  0x57   : > { %968 = vperm.xlu0 %1272, %v965_v33  }
  0x96   : > { %v1806_v39 = vpop.permute.xlu1 %334  ;;  %v239_v40 = vpop.permute.xlu0 %238 }
  0x97   : > { %v417_v41 = vmul.f32 %v1792_v34, %v239_v40  ;;  %v693_v42 = vmul.f32 %v1795_v35, %v239_v40  ;;  %v762_v43 = vmul.f32 %v1798_v36, %v239_v40  ;;  %v831_v44 = vmul.f32 %v1801_v37, %v239_v40 }
  0x98   : > { %v900_v45 = vmul.f32 %v1804_v38, %v239_v40  ;;  %v486_v1 = vmul.f32 %v1833_v57, %v239_v40  ;;  %v555_v25 = vmul.f32 %v1872_v17, %v239_v40  ;;  %v624_v27 = vmul.f32 %v1877_v19, %v239_v40 }
  0x99   : > { %v433_v46 = vadd.f32 %v417_v41, %v1806_v39  ;;  %v1815_v47 = vadd.f32 %v693_v42, %v1806_v39  ;;  %v1818_v48 = vadd.f32 %v762_v43, %v1806_v39  ;;  %v1821_v49 = vadd.f32 %v831_v44, %v1806_v39 }
  0x9a   : > { %v1823_v50 = vpop.permute.xlu1 %339  ;;  %v244_v51 = vpop.permute.xlu0 %243  ;;  %v1826_v52 = vadd.f32 %v900_v45, %v1806_v39  ;;  %v502_v8 = vadd.f32 %v486_v1, %v1806_v39  ;;  %v571_v45 = vadd.f32 %v555_v25, %v1806_v39 }
  0x9b   : > { %1274 = vtanh.f32 %v433_v46  ;;  %v418_v53 = vmul.f32 %v1792_v34, %v244_v51  ;;  %v694_v54 = vmul.f32 %v1795_v35, %v244_v51  ;;  %v763_v55 = vmul.f32 %v1798_v36, %v244_v51 }
  0x9c   : > { %2490 = vst [vmem:[#allocation5_spill] sm:$0xff] %v1826_v52  ;;  %v832_v56 = vmul.f32 %v1801_v37, %v244_v51  ;;  %v901_v0 = vmul.f32 %v1804_v38, %v244_v51  ;;  %v487_v9 = vmul.f32 %v1833_v57, %v244_v51  ;;  %v556_v30 = vmul.f32 %v1872_v17, %v244_v51 }
  0x9d   : > { %v434_v58 = vadd.f32 %v418_v53, %v1823_v50  ;;  %v1837_v59 = vadd.f32 %v694_v54, %v1823_v50  ;;  %v1840_v60 = vadd.f32 %v763_v55, %v1823_v50  ;;  %v625_v31 = vmul.f32 %v1877_v19, %v244_v51 }
  0x9e   : > { %v1843_v61 = vadd.f32 %v832_v56, %v1823_v50  ;;  %v1845_v62 = vpop.permute.xlu1 %253  ;;  %v1847_v63 = vpop.permute.xlu0 %248  ;;  %v1860_v6 = vadd.f32 %v901_v0, %v1823_v50  ;;  %v503_v15 = vadd.f32 %v487_v9, %v1823_v50  ;;  %v1903_v46 = vadd.f32 %v624_v27, %v1806_v39 }
  0x9f   : > { %2491 = vst [vmem:[#allocation6_spill] sm:$0xff] %v1845_v62  ;;  %2492 = vst [vmem:[#allocation7_spill] sm:$0xff] %v1847_v63  ;;  %1276 = vtanh.f32 %v434_v58  ;;  %v420_v2 = vmul.f32 %v1792_v34, %v1845_v62  ;;  %v419_v3 = vmul.f32 %v1792_v34, %v1847_v63  ;;  %v489_v26 = vmul.f32 %v1833_v57, %v1845_v62 }
  0xa0   : > { %2495 = vst [vmem:[#allocation10_spill] sm:$0xff] %v1860_v6  ;;  %v488_v28 = vmul.f32 %v1833_v57, %v1847_v63  ;;  %v572_v51 = vadd.f32 %v556_v30, %v1823_v50  ;;  %v1907_v55 = vadd.f32 %v625_v31, %v1823_v50  ;;  %v558_v25 = vmul.f32 %v1872_v17, %v1845_v62 }
  0xa2   : > { %v1855_v4 = vpop.permute.xlu1 %349  ;;  %v1857_v5 = vpop.permute.xlu0 %344 }
  0xa3   : > { %2493 = vst [vmem:[#allocation8_spill] sm:$0xff] %v1855_v4  ;;  %2494 = vst [vmem:[#allocation9_spill] sm:$0xff] %v1857_v5  ;;  %v436_v7 = vadd.f32 %v420_v2, %v1855_v4  ;;  %v435_v10 = vadd.f32 %v419_v3, %v1857_v5  ;;  %v505_v32 = vadd.f32 %v489_v26, %v1855_v4 }
  0xa4   : > { %v504_v43 = vadd.f32 %v488_v28, %v1857_v5  ;;  %v627_v26 = vmul.f32 %v1877_v19, %v1845_v62 }
  0xa5   : > { %v1275_v11 = vpop.eup %1274  ;;  %1278 = vtanh.f32 %v436_v7 }
  0xa6   : > { %v518_v12 = vadd.f32 %v1275_v11, %v502_v8  ;;  %1280 = vtanh.f32 %v435_v10  ;;  %v1866_v13 = vpop.permute.xlu1 %263  ;;  %v1868_v14 = vpop.permute.xlu0 %258 }
  0xa7   : > { %2496 = vst [vmem:[#allocation11_spill] sm:$0xff] %v1866_v13  ;;  %2497 = vst [vmem:[#allocation12_spill] sm:$0xff] %v1868_v14  ;;  %v422_v18 = vmul.f32 %v1792_v34, %v1866_v13  ;;  %v421_v23 = vmul.f32 %v1792_v34, %v1868_v14  ;;  %v491_v39 = vmul.f32 %v1833_v57, %v1866_v13 }
  0xa8   : > { %1282 = vtanh.f32 %v518_v12  ;;  %v490_v50 = vmul.f32 %v1833_v57, %v1868_v14  ;;  %v835_v6 = vmul.f32 %v1801_v37, %v1868_v14 }
  0xa9   : > { %v1277_v16 = vpop.eup %1276 }
  0xaa   : > { %v519_v20 = vadd.f32 %v1277_v16, %v503_v15  ;;  %v1879_v21 = vpop.permute.xlu1 %359  ;;  %v1881_v22 = vpop.permute.xlu0 %354 }
  0xab   : > { %v438_v24 = vadd.f32 %v422_v18, %v1879_v21  ;;  %v437_v29 = vadd.f32 %v421_v23, %v1881_v22  ;;  %v507_v9 = vadd.f32 %v491_v39, %v1879_v21  ;;  %v506_v27 = vadd.f32 %v490_v50, %v1881_v22 }
  0xac   : > { %1284 = vtanh.f32 %v519_v20  ;;  %v833_v50 = vmul.f32 %v1801_v37, %v1847_v63 }
  0xad   : > { %1286 = vtanh.f32 %v438_v24 }
  0xae   : > { %v1896_v33 = vpop.permute.xlu1 %273  ;;  %v1898_v41 = vpop.permute.xlu0 %268  ;;  %1288 = vtanh.f32 %v437_v29 }
  0xaf   : > { %v1279_v42 = vpop.eup %1278  ;;  %v424_v56 = vmul.f32 %v1792_v34, %v1896_v33  ;;  %v769_v2 = vmul.f32 %v1798_v36, %v1896_v33  ;;  %v838_v3 = vmul.f32 %v1801_v37, %v1896_v33  ;;  %v423_v7 = vmul.f32 %v1792_v34, %v1898_v41 }
  0xb0   : > { %v1281_v40 = vpop.eup %1280  ;;  %v521_v44 = vadd.f32 %v1279_v42, %v505_v32  ;;  %v768_v10 = vmul.f32 %v1798_v36, %v1898_v41  ;;  %v837_v15 = vmul.f32 %v1801_v37, %v1898_v41  ;;  %v696_v42 = vmul.f32 %v1795_v35, %v1845_v62 }
  0xb1   : > { %v520_v53 = vadd.f32 %v1281_v40, %v504_v43  ;;  %v765_v43 = vmul.f32 %v1798_v36, %v1845_v62  ;;  %v834_v40 = vmul.f32 %v1801_v37, %v1845_v62  ;;  %v561_v52 = vmul.f32 %v1872_v17, %v1898_v41 }
  0xb2   : > { %v1283_v54 = vpop.eup %1282  ;;  %1290 = vtanh.f32 %v521_v44  ;;  %v1911_v58 = vpop.permute.xlu1 %369  ;;  %v557_v44 = vmul.f32 %v1872_v17, %v1847_v63 }
  0xb3   : > { %v1913_v0 = vpop.permute.xlu0 %364  ;;  %v587_v1 = vadd.f32 %v1283_v54, %v571_v45  ;;  %1292 = vtanh.f32 %v520_v53  ;;  %v440_v8 = vadd.f32 %v424_v56, %v1911_v58  ;;  %v1930_v11 = vadd.f32 %v769_v2, %v1911_v58 }
  0xb4   : > { %v1935_v16 = vadd.f32 %v838_v3, %v1911_v58  ;;  %v439_v18 = vadd.f32 %v423_v7, %v1913_v0  ;;  %v1948_v30 = vadd.f32 %v768_v10, %v1913_v0  ;;  %v1951_v31 = vadd.f32 %v837_v15, %v1913_v0 }
  0xb5   : > { %1294 = vtanh.f32 %v587_v1  ;;  %v626_v45 = vmul.f32 %v1877_v19, %v1847_v63  ;;  %v764_v56 = vmul.f32 %v1798_v36, %v1847_v63  ;;  %v574_v1 = vadd.f32 %v558_v25, %v1855_v4 }
  0xb6   : > { %v1285_v12 = vpop.eup %1284  ;;  %1296 = vtanh.f32 %v440_v8  ;;  %v1938_v20 = vpop.permute.xlu1 %283  ;;  %2498 = vst [vmem:[#allocation13_spill] sm:$0xff] %v1951_v31  ;;  %v1975_v3 = vadd.f32 %v627_v26, %v1855_v4  ;;  %v573_v7 = vadd.f32 %v557_v44, %v1857_v5  ;;  %v493_v10 = vmul.f32 %v1833_v57, %v1896_v33 }
  0xb7   : > { %v1287_v23 = vpop.eup %1286  ;;  %v588_v24 = vadd.f32 %v1285_v12, %v572_v51  ;;  %v1945_v28 = vpop.permute.xlu0 %278  ;;  %1298 = vtanh.f32 %v439_v18  ;;  %v695_v51 = vmul.f32 %v1795_v35, %v1847_v63  ;;  %v426_v39 = vmul.f32 %v1792_v34, %v1938_v20 }
  0xb8   : > { %v523_v29 = vadd.f32 %v1287_v23, %v507_v9  ;;  %v1289_v32 = vpop.eup %1288  ;;  %v840_v12 = vmul.f32 %v1801_v37, %v1938_v20  ;;  %v1986_v23 = vadd.f32 %v696_v42, %v1855_v4  ;;  %v425_v26 = vmul.f32 %v1792_v34, %v1945_v28 }
  0xb9   : > { %1300 = vtanh.f32 %v588_v24  ;;  %v522_v53 = vadd.f32 %v1289_v32, %v506_v27  ;;  %v1989_v24 = vadd.f32 %v765_v43, %v1855_v4  ;;  %v509_v32 = vadd.f32 %v493_v10, %v1911_v58 }
  0xba   : > { %1302 = vtanh.f32 %v523_v29  ;;  %v1963_v54 = vpop.permute.xlu1 %379  ;;  %v492_v29 = vmul.f32 %v1833_v57, %v1898_v41  ;;  %v2009_v10 = vadd.f32 %v834_v40, %v1855_v4  ;;  %v2023_v40 = vadd.f32 %v764_v56, %v1857_v5 }
  0xbb   : > { %1304 = vtanh.f32 %v522_v53  ;;  %v442_v15 = vadd.f32 %v426_v39, %v1963_v54  ;;  %v1983_v18 = vpop.permute.xlu0 %374  ;;  %v1997_v44 = vadd.f32 %v840_v12, %v1963_v54 }
  0xbc   : > { %v1291_v2 = vpop.eup %1290  ;;  %v441_v39 = vadd.f32 %v425_v26, %v1983_v18  ;;  %v559_v26 = vmul.f32 %v1872_v17, %v1868_v14 }
  0xbd   : > { %v1293_v8 = vpop.eup %1292  ;;  %v590_v9 = vadd.f32 %v1291_v2, %v574_v1  ;;  %2499 = vst [vmem:[#allocation14_spill] sm:$0xff] %v1997_v44  ;;  %v839_v1 = vmul.f32 %v1801_v37, %v1945_v28  ;;  %v560_v2 = vmul.f32 %v1872_v17, %v1866_v13 }
  0xbe   : > { %v589_v25 = vadd.f32 %v1293_v8, %v573_v7  ;;  %v1999_v53 = vpop.permute.xlu1 %293  ;;  %v508_v8 = vadd.f32 %v492_v29, %v1913_v0 }
  0xbf   : > { %v1295_v27 = vpop.eup %1294  ;;  %1306 = vtanh.f32 %v590_v9  ;;  %v2013_v12 = vadd.f32 %v839_v1, %v1983_v18  ;;  %v575_v1 = vadd.f32 %v559_v26, %v1881_v22  ;;  %v428_v56 = vmul.f32 %v1792_v34, %v1999_v53 }
  0xc0   : > { %v1297_v42 = vpop.eup %1296  ;;  %v656_v43 = vadd.f32 %v1295_v27, %v1903_v46  ;;  %1308 = vtanh.f32 %v589_v25  ;;  %v642_v46 = vadd.f32 %v626_v45, %v1857_v5  ;;  %v576_v27 = vadd.f32 %v560_v2, %v1879_v21  ;;  %v2029_v2 = vpop.permute.xlu0 %288 }
  0xc1   : > { %v525_v7 = vadd.f32 %v1297_v42, %v509_v32  ;;  %1310 = vtanh.f32 %v442_v15  ;;  %v1299_v9 = vpop.eup %1298  ;;  %2500 = vst [vmem:[#allocation15_spill] sm:$0xff] %v2013_v12  ;;  %v2020_v42 = vadd.f32 %v695_v51, %v1857_v5  ;;  %v2026_v45 = vadd.f32 %v833_v50, %v1857_v5 }
  0xc2   : > { %1312 = vtanh.f32 %v656_v43  ;;  %v524_v32 = vadd.f32 %v1299_v9, %v508_v8  ;;  %v698_v51 = vmul.f32 %v1795_v35, %v1866_v13  ;;  %v767_v50 = vmul.f32 %v1798_v36, %v1866_v13 }
  0xc3   : > { %v1301_v25 = vpop.eup %1300  ;;  %1314 = vtanh.f32 %v525_v7  ;;  %v2031_v7 = vpop.permute.xlu1 %389  ;;  %v697_v26 = vmul.f32 %v1795_v35, %v1868_v14  ;;  %v562_v12 = vmul.f32 %v1872_v17, %v1896_v33 }
  0xc4   : > { %v1303_v29 = vpop.eup %1302  ;;  %v657_v15 = vadd.f32 %v1301_v25, %v1907_v55  ;;  %1316 = vtanh.f32 %v441_v39  ;;  %v629_v55 = vmul.f32 %v1877_v19, %v1866_v13  ;;  %v836_v39 = vmul.f32 %v1801_v37, %v1866_v13  ;;  %v2067_v4 = vpop.permute.xlu0 %384 }
  0xc5   : > { %v592_v43 = vadd.f32 %v1303_v29, %v576_v27  ;;  %1318 = vtanh.f32 %v524_v32  ;;  %v1305_v8 = vpop.eup %1304  ;;  %v628_v25 = vmul.f32 %v1877_v19, %v1868_v14  ;;  %v495_v27 = vmul.f32 %v1833_v57, %v1938_v20 }
  0xc6   : > { %1320 = vtanh.f32 %v657_v15  ;;  %v591_v9 = vadd.f32 %v1305_v8, %v575_v1  ;;  %v444_v32 = vadd.f32 %v428_v56, %v2031_v7  ;;  %v766_v15 = vmul.f32 %v1798_v36, %v1868_v14 }
  0xc7   : > { %1322 = vtanh.f32 %v592_v43  ;;  %v842_v43 = vmul.f32 %v1801_v37, %v1999_v53  ;;  %v511_v13 = vadd.f32 %v495_v27, %v1963_v54  ;;  %v841_v27 = vmul.f32 %v1801_v37, %v2029_v2 }
  0xc8   : > { %1324 = vtanh.f32 %v591_v9  ;;  %v494_v9 = vmul.f32 %v1833_v57, %v1945_v28  ;;  %v645_v5 = vadd.f32 %v629_v55, %v1879_v21  ;;  %v2087_v55 = vadd.f32 %v767_v50, %v1879_v21 }
  0xc9   : > { %v1307_v29 = vpop.eup %1306  ;;  %1326 = vtanh.f32 %v444_v32  ;;  %v2065_v14 = vadd.f32 %v842_v43, %v2031_v7  ;;  %v2098_v50 = vadd.f32 %v697_v26, %v1881_v22  ;;  %v2111_v26 = vadd.f32 %v835_v6, %v1881_v22 }
  0xca   : > { %v1309_v1 = vpop.eup %1308  ;;  %v659_v8 = vadd.f32 %v1307_v29, %v1975_v3  ;;  %v578_v29 = vadd.f32 %v562_v12, %v1911_v58  ;;  %v510_v43 = vadd.f32 %v494_v9, %v1983_v18  ;;  %v2090_v9 = vadd.f32 %v836_v39, %v1879_v21  ;;  %v2100_v39 = vpop.permute.xlu0 %298 }
  0xcb   : > { %v1311_v56 = vpop.eup %1310  ;;  %v658_v44 = vadd.f32 %v1309_v1, %v642_v46  ;;  %2501 = vst [vmem:[#allocation16_spill] sm:$0xff] %v2065_v14  ;;  %v2072_v46 = vpop.permute.xlu1 %303  ;;  %v630_v6 = vmul.f32 %v1877_v19, %v1898_v41 }
  0xcc   : > { %v1313_v3 = vpop.eup %1312  ;;  %1328 = vtanh.f32 %v659_v8  ;;  %v527_v62 = vadd.f32 %v1311_v56, %v511_v13  ;;  %v577_v8 = vadd.f32 %v561_v52, %v1913_v0  ;;  %v2079_v13 = vadd.f32 %v841_v27, %v2067_v4 }
  0xcd   : > { %v1315_v32 = vpop.eup %1314  ;;  %v725_v1 = vadd.f32 %v1313_v3, %v1815_v47  ;;  %1330 = vtanh.f32 %v658_v44  ;;  %v2082_v56 = vadd.f32 %v698_v51, %v1879_v21  ;;  %v427_v47 = vmul.f32 %v1792_v34, %v2029_v2 }
  0xce   : > { %v1317_v14 = vpop.eup %1316  ;;  %v594_v31 = vadd.f32 %v1315_v32, %v578_v29  ;;  %1332 = vtanh.f32 %v527_v62  ;;  %2502 = vst [vmem:[#allocation17_spill] sm:$0xff] %v2079_v13  ;;  %v497_v51 = vmul.f32 %v1833_v57, %v1999_v53  ;;  %v644_v27 = vadd.f32 %v628_v25, %v1881_v22 }
  0xcf   : > { %v1319_v12 = vpop.eup %1318  ;;  %1334 = vtanh.f32 %v725_v1  ;;  %v526_v63 = vadd.f32 %v1317_v14, %v510_v43  ;;  %v443_v14 = vadd.f32 %v427_v47, %v2067_v4  ;;  %v564_v43 = vmul.f32 %v1872_v17, %v1938_v20 }
  0xd0   : > { %v1321_v44 = vpop.eup %1320  ;;  %1336 = vtanh.f32 %v594_v31  ;;  %v593_v52 = vadd.f32 %v1319_v12, %v577_v8  ;;  %v2102_v31 = vpop.permute.xlu1 %399 }
  0xd1   : > { %v1323_v62 = vpop.eup %1322  ;;  %v726_v3 = vadd.f32 %v1321_v44, %v1837_v59  ;;  %1338 = vtanh.f32 %v526_v63  ;;  %v2105_v59 = vadd.f32 %v766_v15, %v1881_v22  ;;  %v513_v63 = vadd.f32 %v497_v51, %v2031_v7 }
  0xd2   : > { %v661_v29 = vadd.f32 %v1323_v62, %v645_v5  ;;  %1340 = vtanh.f32 %v593_v52  ;;  %v1325_v32 = vpop.eup %1324  ;;  %v430_v5 = vmul.f32 %v1792_v34, %v2072_v46  ;;  %v844_v15 = vmul.f32 %v1801_v37, %v2072_v46 }
  0xd3   : > { %1342 = vtanh.f32 %v726_v3  ;;  %v1327_v1 = vpop.eup %1326  ;;  %v660_v25 = vadd.f32 %v1325_v32, %v644_v27  ;;  %v631_v44 = vmul.f32 %v1877_v19, %v1896_v33  ;;  %v700_v52 = vmul.f32 %v1795_v35, %v1896_v33 }
  0xd4   : > { %1344 = vtanh.f32 %v661_v29  ;;  %v529_v8 = vadd.f32 %v1327_v1, %v513_v63  ;;  %v446_v12 = vadd.f32 %v430_v5, %v2102_v31  ;;  %v580_v51 = vadd.f32 %v564_v43, %v1963_v54  ;;  %v2134_v5 = vpop.permute.xlu0 %394 }
  0xd5   : > { %1346 = vtanh.f32 %v443_v14  ;;  %v2127_v14 = vadd.f32 %v844_v15, %v2102_v31  ;;  %v699_v32 = vmul.f32 %v1795_v35, %v1898_v41  ;;  %v563_v63 = vmul.f32 %v1872_v17, %v1945_v28 }
  0xd6   : > { %v1329_v47 = vpop.eup %1328  ;;  %1348 = vtanh.f32 %v660_v25  ;;  %v843_v43 = vmul.f32 %v1801_v37, %v2100_v39  ;;  %v2141_v15 = vadd.f32 %v700_v52, %v1911_v58  ;;  %v496_v52 = vmul.f32 %v1833_v57, %v2029_v2 }
  0xd7   : > { %v1331_v62 = vpop.eup %1330  ;;  %v728_v3 = vadd.f32 %v1329_v47, %v1986_v23  ;;  %1350 = vtanh.f32 %v529_v8  ;;  %2503 = vst [vmem:[#allocation18_spill] sm:$0xff] %v2127_v14  ;;  %v647_v23 = vadd.f32 %v631_v44, %v1911_v58  ;;  %v579_v47 = vadd.f32 %v563_v63, %v1983_v18 }
  0xd8   : > { %v1333_v29 = vpop.eup %1332  ;;  %v727_v27 = vadd.f32 %v1331_v62, %v2020_v42  ;;  %1352 = vtanh.f32 %v446_v12  ;;  %v646_v14 = vadd.f32 %v630_v6, %v1913_v0  ;;  %v2146_v44 = vadd.f32 %v843_v43, %v2134_v5 }
  0xd9   : > { %v1335_v1 = vpop.eup %1334  ;;  %1354 = vtanh.f32 %v728_v3  ;;  %v596_v25 = vadd.f32 %v1333_v29, %v580_v51  ;;  %v2149_v51 = vadd.f32 %v699_v32, %v1913_v0  ;;  %v633_v63 = vmul.f32 %v1877_v19, %v1938_v20 }
  0xda   : > { %v1337_v8 = vpop.eup %1336  ;;  %v794_v42 = vadd.f32 %v1335_v1, %v1818_v48  ;;  %1356 = vtanh.f32 %v727_v27  ;;  %2504 = vst [vmem:[#allocation19_spill] sm:$0xff] %v2146_v44  ;;  %v702_v6 = vmul.f32 %v1795_v35, %v1938_v20  ;;  %v2157_v1 = vpop.permute.xlu1 %313  ;;  %v566_v32 = vmul.f32 %v1872_v17, %v1999_v53 }
  0xdb   : > { %v1339_v12 = vpop.eup %1338  ;;  %v663_v62 = vadd.f32 %v1337_v8, %v647_v23  ;;  %1358 = vtanh.f32 %v596_v25  ;;  %v512_v43 = vadd.f32 %v496_v52, %v2067_v4 }
  0xdc   : > { %v1341_v3 = vpop.eup %1340  ;;  %1360 = vtanh.f32 %v794_v42  ;;  %v595_v48 = vadd.f32 %v1339_v12, %v579_v47  ;;  %v632_v42 = vmul.f32 %v1877_v19, %v1945_v28  ;;  %v499_v47 = vmul.f32 %v1833_v57, %v2072_v46 }
  0xdd   : > { %v1343_v29 = vpop.eup %1342  ;;  %1362 = vtanh.f32 %v663_v62  ;;  %v662_v27 = vadd.f32 %v1341_v3, %v646_v14  ;;  %v582_v62 = vadd.f32 %v566_v32, %v2031_v7  ;;  %v2177_v44 = vadd.f32 %v702_v6, %v1963_v54 }
  0xde   : > { %v1345_v23 = vpop.eup %1344  ;;  %v795_v25 = vadd.f32 %v1343_v29, %v1840_v60  ;;  %1364 = vtanh.f32 %v595_v48  ;;  %v701_v60 = vmul.f32 %v1795_v35, %v1945_v28  ;;  %v515_v29 = vadd.f32 %v499_v47, %v2102_v31 }
  0xdf   : > { %v1347_v8 = vpop.eup %1346  ;;  %v730_v14 = vadd.f32 %v1345_v23, %v2082_v56  ;;  %1366 = vtanh.f32 %v662_v27  ;;  %v649_v56 = vadd.f32 %v633_v63, %v1963_v54  ;;  %v2174_v27 = vpop.permute.xlu0 %308  ;;  %v846_v6 = vmul.f32 %v1801_v37, %v2157_v1 }
  0xe0   : > { %v1349_v12 = vpop.eup %1348  ;;  %1368 = vtanh.f32 %v795_v25  ;;  %v528_v3 = vadd.f32 %v1347_v8, %v512_v43  ;;  %v648_v25 = vadd.f32 %v632_v42, %v1983_v18  ;;  %v2181_v43 = vadd.f32 %v701_v60, %v1983_v18  ;;  %v2185_v8 = vpop.permute.xlu1 %409 }
  0xe1   : > { %v1351_v48 = vpop.eup %1350  ;;  %1370 = vtanh.f32 %v730_v14  ;;  %v729_v52 = vadd.f32 %v1349_v12, %v2098_v50  ;;  %v429_v50 = vmul.f32 %v1792_v34, %v2100_v39  ;;  %v915_v42 = vmul.f32 %v1804_v38, %v2157_v1 }
  0xe2   : > { %v1353_v23 = vpop.eup %1352  ;;  %v598_v13 = vadd.f32 %v1351_v48, %v582_v62  ;;  %1372 = vtanh.f32 %v528_v3  ;;  %v635_v62 = vmul.f32 %v1877_v19, %v1999_v53 }
  0xe3   : > { %v1355_v32 = vpop.eup %1354  ;;  %1374 = vtanh.f32 %v729_v52  ;;  %v531_v63 = vadd.f32 %v1353_v23, %v515_v29  ;;  %v445_v3 = vadd.f32 %v429_v50, %v2134_v5  ;;  %v2211_v50 = vpop.permute.xlu0 %404 }
  0xe4   : > { %v1357_v14 = vpop.eup %1356  ;;  %v797_v47 = vadd.f32 %v1355_v32, %v1989_v24  ;;  %1376 = vtanh.f32 %v598_v13  ;;  %v2197_v24 = vadd.f32 %v846_v6, %v2185_v8  ;;  %v2200_v13 = vadd.f32 %v915_v42, %v2185_v8 }
  0xe5   : > { %v1359_v12 = vpop.eup %1358  ;;  %v796_v60 = vadd.f32 %v1357_v14, %v2023_v40  ;;  %1378 = vtanh.f32 %v531_v63  ;;  %v2207_v40 = vmul.f32 %v1795_v35, %v1999_v53  ;;  %v432_v32 = vmul.f32 %v1792_v34, %v2157_v1 }
  0xe6   : > { %v1361_v48 = vpop.eup %1360  ;;  %1380 = vtanh.f32 %v797_v47  ;;  %v665_v52 = vadd.f32 %v1359_v12, %v649_v56  ;;  %v565_v14 = vmul.f32 %v1872_v17, %v2029_v2  ;;  %v2220_v42 = vmul.f32 %v1877_v19, %v2029_v2 }
  0xe7   : > { %v1363_v29 = vpop.eup %1362  ;;  %v2203_v23 = vadd.f32 %v1361_v48, %v1821_v49  ;;  %1382 = vtanh.f32 %v796_v60  ;;  %v845_v49 = vmul.f32 %v1801_v37, %v2174_v27  ;;  %v448_v12 = vadd.f32 %v432_v32, %v2185_v8 }
  0xe8   : > { %v1365_v56 = vpop.eup %1364  ;;  %v732_v63 = vadd.f32 %v1363_v29, %v2141_v15  ;;  %1384 = vtanh.f32 %v665_v52  ;;  %v581_v37 = vadd.f32 %v565_v14, %v2067_v4 }
  0xe9   : > { %v1367_v47 = vpop.eup %1366  ;;  %v664_v6 = vadd.f32 %v1365_v56, %v648_v25  ;;  %1386 = vtanh.f32 %v445_v3  ;;  %v2225_v48 = vadd.f32 %v845_v49, %v2211_v50  ;;  %v568_v25 = vmul.f32 %v1872_v17, %v2072_v46 }
  0xea   : > { %v1369_v60 = vpop.eup %1368  ;;  %1388 = vtanh.f32 %v732_v63  ;;  %v731_v15 = vadd.f32 %v1367_v47, %v2149_v51  ;;  %v2486_v3 = vmov 0.0|0.0   ;;  %v498_v51 = vmul.f32 %v1833_v57, %v2100_v39 }
  0xeb   : > { %2505 = vst [vmem:[#allocation20_spill] sm:$0xff] %v2225_v48  ;;  %v1371_v52 = vpop.eup %1370  ;;  %v2228_v29 = vadd.f32 %v1369_v60, %v1843_v61  ;;  %1390 = vtanh.f32 %v664_v6  ;;  %1205 = vmatprep.subr.bf16.mxu0 %v2486_v3  ;;  %v501_v61 = vmul.f32 %v1833_v57, %v2157_v1  ;;  %v651_v49 = vadd.f32 %v635_v62, %v2031_v7 }
  0xec   : > { %v1373_v32 = vpop.eup %1372  ;;  %v799_v56 = vadd.f32 %v1371_v52, %v2087_v55  ;;  %1392 = vtanh.f32 %v731_v15  ;;  %v584_v47 = vadd.f32 %v568_v25, %v2102_v31  ;;  %v514_v55 = vadd.f32 %v498_v51, %v2134_v5 }
  0xed   : > { %v1375_v63 = vpop.eup %1374  ;;  %v597_v14 = vadd.f32 %v1373_v32, %v581_v37  ;;  %1394 = vtanh.f32 %v448_v12  ;;  %v517_v15 = vadd.f32 %v501_v61, %v2185_v8  ;;  %v906_v48 = vmul.f32 %v1804_v38, %v1898_v41 }
  0xee   : > { %v1377_v6 = vpop.eup %1376  ;;  %1396 = vtanh.f32 %v799_v56  ;;  %v798_v60 = vadd.f32 %v1375_v63, %v2105_v59  ;;  %v907_v62 = vmul.f32 %v1804_v38, %v1896_v33  ;;  %v908_v25 = vmul.f32 %v1804_v38, %v1945_v28 }
  0xef   : > { %v1379_v52 = vpop.eup %1378  ;;  %v667_v3 = vadd.f32 %v1377_v6, %v651_v49  ;;  %1398 = vtanh.f32 %v597_v14  ;;  %v909_v59 = vmul.f32 %v1804_v38, %v1938_v20  ;;  %v2254_v51 = vadd.f32 %v906_v48, %v1913_v0 }
  0xf0   : > { %v1381_v37 = vpop.eup %1380  ;;  %1400 = vtanh.f32 %v798_v60  ;;  %v600_v12 = vadd.f32 %v1379_v52, %v584_v47  ;;  %v2257_v41 = vadd.f32 %v907_v62, %v1911_v58  ;;  %v2261_v63 = vadd.f32 %v908_v25, %v1983_v18 }
  0xf1   : > { %v1383_v32 = vpop.eup %1382  ;;  %v866_v56 = vadd.f32 %v1381_v37, %v2009_v10  ;;  %1402 = vtanh.f32 %v667_v3  ;;  %v2264_v49 = vadd.f32 %v909_v59, %v1963_v54  ;;  %v910_v0 = vmul.f32 %v1804_v38, %v2029_v2 }
  0xf2   : > { %v1385_v33 = vpop.eup %1384  ;;  %v865_v61 = vadd.f32 %v1383_v32, %v2026_v45  ;;  %1404 = vtanh.f32 %v600_v12  ;;  %v911_v58 = vmul.f32 %v1804_v38, %v1999_v53  ;;  %v912_v3 = vmul.f32 %v1804_v38, %v2100_v39 }
  0xf3   : > { %v1387_v14 = vpop.eup %1386  ;;  %1406 = vtanh.f32 %v866_v56  ;;  %v734_v10 = vadd.f32 %v1385_v33, %v2177_v44  ;;  %v913_v47 = vmul.f32 %v1804_v38, %v2072_v46  ;;  %v2277_v44 = vadd.f32 %v910_v0, %v2067_v4 }
  0xf4   : > { %v1389_v48 = vpop.eup %1388  ;;  %1408 = vtanh.f32 %v865_v61  ;;  %v530_v45 = vadd.f32 %v1387_v14, %v514_v55  ;;  %v2280_v52 = vadd.f32 %v911_v58, %v2031_v7  ;;  %v2284_v55 = vadd.f32 %v912_v3, %v2134_v5 }
  0xf5   : > { %v1391_v6 = vpop.eup %1390  ;;  %v801_v60 = vadd.f32 %v1389_v48, %v1930_v11  ;;  %1410 = vtanh.f32 %v734_v10  ;;  %v2287_v12 = vadd.f32 %v913_v47, %v2102_v31  ;;  %v914_v59 = vmul.f32 %v1804_v38, %v2174_v27 }
  0xf6   : > { %v1393_v62 = vpop.eup %1392  ;;  %v733_v37 = vadd.f32 %v1391_v6, %v2181_v43  ;;  %1412 = vtanh.f32 %v530_v45  ;;  %v650_v56 = vadd.f32 %v2220_v42, %v2067_v4  ;;  %v637_v14 = vmul.f32 %v1877_v19, %v2072_v46 }
  0xf7   : > { %v1395_v25 = vpop.eup %1394  ;;  %1414 = vtanh.f32 %v801_v60  ;;  %v800_v11 = vadd.f32 %v1393_v62, %v1948_v30  ;;  %v2298_v10 = vadd.f32 %v914_v59, %v2211_v50  ;;  %v1605_v30 = vmov 0.0  }
  0xf8   : > { %v1397_v32 = vpop.eup %1396  ;;  %1416 = vtanh.f32 %v733_v37  ;;  %v533_v43 = vadd.f32 %v1395_v25, %v517_v15  ;;  %1202 = vmatprep.mubr.msk.f32.mxu0 %vm1604_vm0, %v1605_v30  ;;  %v720_v58 = vadd.f32 %v2207_v40, %v2031_v7  ;;  %v431_v42 = vmul.f32 %v1792_v34, %v2174_v27 }
  0xf9   : > { %v1399_v33 = vpop.eup %1398  ;;  %v868_v61 = vadd.f32 %v1397_v32, %v2090_v9  ;;  %1418 = vtanh.f32 %v800_v11  ;;  %v653_v45 = vadd.f32 %v637_v14, %v2102_v31  ;;  %v771_v47 = vmul.f32 %v1798_v36, %v1938_v20 }
  0xfa   : > { %v1401_v0 = vpop.eup %1400  ;;  %v666_v48 = vadd.f32 %v1399_v33, %v650_v56  ;;  %1420 = vtanh.f32 %v533_v43  ;;  %v447_v60 = vadd.f32 %v431_v42, %v2211_v50  ;;  %v567_v34 = vmul.f32 %v1872_v17, %v2100_v39 }
  0xfb   : > { %v1403_v9 = vpop.eup %1402  ;;  %1422 = vtanh.f32 %v868_v61  ;;  %v867_v15 = vadd.f32 %v1401_v0, %v2111_v26  ;;  %v787_v26 = vadd.f32 %v771_v47, %v1963_v54  ;;  %v770_v11 = vmul.f32 %v1798_v36, %v1945_v28  ;;  %v2506_v28 = vld [vmem:[#allocation7_spill] sm:$0xff] }
  0xfc   : > { %v1405_v3 = vpop.eup %1404  ;;  %v736_v6 = vadd.f32 %v1403_v9, %v720_v58  ;;  %1424 = vtanh.f32 %v666_v48  ;;  %v583_v20 = vadd.f32 %v567_v34, %v2134_v5  ;;  %v570_v61 = vmul.f32 %v1872_v17, %v2157_v1  ;;  %v2507_v9 = vld [vmem:[#allocation13_spill] sm:$0xff] }
  0xfd   : > { %v2309_v40 = vpop.eup %1406  ;;  %1426 = vtanh.f32 %v867_v15  ;;  %v669_v62 = vadd.f32 %v1405_v3, %v653_v45  ;;  %v786_v43 = vadd.f32 %v770_v11, %v1983_v18  ;;  %v902_v30 = vmul.f32 %v1804_v38, %v2506_v28  ;;  %v2511_v28 = vld [vmem:[#allocation12_spill] sm:$0xff] }
  0xfe   : > { %v1409_v37 = vpop.eup %1408  ;;  %1428 = vtanh.f32 %v736_v6  ;;  %v703_v48 = vmul.f32 %v1795_v35, %v2029_v2  ;;  %v586_v18 = vadd.f32 %v570_v61, %v2185_v8  ;;  %v706_v34 = vmul.f32 %v1795_v35, %v2072_v46 }
  0xff   : > { %v1411_v25 = vpop.eup %1410  ;;  %1430 = vtanh.f32 %v669_v62 }
 0x100   : > { %v1413_v59 = vpop.eup %1412  ;;  %v803_v32 = vadd.f32 %v1411_v25, %v787_v26  ;;  %1432 = vtanh.f32 %v447_v60  ;;  %v719_v47 = vadd.f32 %v703_v48, %v2067_v4  ;;  %v2512_v48 = vld [vmem:[#allocation5_spill] sm:$0xff] }
 0x101   : > { %v1415_v56 = vpop.eup %1414  ;;  %v599_v33 = vadd.f32 %v1413_v59, %v583_v20  ;;  %1434 = vtanh.f32 %v2203_v23  ;;  %v2508_v23 = vld [vmem:[#allocation9_spill] sm:$0xff]  ;;  %v500_v20 = vmul.f32 %v1833_v57, %v2174_v27 }
 0x102   : > { %v1417_v54 = vpop.eup %1416  ;;  %v870_v14 = vadd.f32 %v1415_v56, %v1935_v16  ;;  %1436 = vtanh.f32 %v803_v32  ;;  %v918_v45 = vadd.f32 %v902_v30, %v2508_v23  ;;  %v773_v16 = vmul.f32 %v1798_v36, %v1999_v53 }
 0x103   : > { %v1419_v0 = vpop.eup %1418  ;;  %v802_v58 = vadd.f32 %v1417_v54, %v786_v43  ;;  %1438 = vtanh.f32 %v599_v33  ;;  %v722_v36 = vadd.f32 %v706_v34, %v2102_v31  ;;  %v516_v35 = vadd.f32 %v500_v20, %v2211_v50  ;;  %v2510_v54 = vld [vmem:[#allocation8_spill] sm:$0xff]  ;;  %v2515_v20 = vld [vmem:[#allocation15_spill] sm:$0xff] }
 0x104   : > { %v1421_v42 = vpop.eup %1420  ;;  %1440 = vtanh.f32 %v870_v14  ;;  %v869_v15 = vadd.f32 %v1419_v0, %v2507_v9  ;;  %v934_v62 = vadd.f32 %v1409_v37, %v918_v45  ;;  %v789_v25 = vadd.f32 %v773_v16, %v2031_v7  ;;  %v2509_v37 = vld [vmem:[#allocation6_spill] sm:$0xff] }
 0x105   : > { %v2329_v3 = vpop.eup %1422  ;;  %1442 = vtanh.f32 %v802_v58  ;;  %v602_v6 = vadd.f32 %v1421_v42, %v586_v18  ;;  %v903_v56 = vmul.f32 %v1804_v38, %v2509_v37  ;;  %v636_v43 = vmul.f32 %v1877_v19, %v2100_v39  ;;  %v2513_v42 = vld [vmem:[#allocation14_spill] sm:$0xff] }
 0x106   : > { %v1425_v60 = vpop.eup %1424  ;;  %1444 = vtanh.f32 %v869_v15 }
 0x107   : > { %v1427_v26 = vpop.eup %1426  ;;  %v735_v11 = vadd.f32 %v1425_v60, %v719_v47  ;;  %1446 = vtanh.f32 %v602_v6  ;;  %v919_v14 = vadd.f32 %v903_v56, %v2510_v54  ;;  %v652_v58 = vadd.f32 %v636_v43, %v2134_v5  ;;  %v2514_v60 = vld [vmem:[#allocation11_spill] sm:$0xff]  ;;  %v2517_v54 = vld [vmem:[#allocation16_spill] sm:$0xff] }
 0x108   : > { %v1429_v59 = vpop.eup %1428  ;;  %1448 = vtanh.f32 %v2228_v29  ;;  %v1534_v29 = vld [vmem:[%s1789_s11 + $0x7] ss:$0 sm:$0xff]  ;;  %v639_v47 = vmul.f32 %v1877_v19, %v2157_v1 }
 0x109   : > { %v1431_v53 = vpop.eup %1430  ;;  %v805_v32 = vadd.f32 %v1429_v59, %v789_v25  ;;  %1450 = vtanh.f32 %v735_v11  ;;  %v904_v30 = vmul.f32 %v1534_v29, %v2511_v28  ;;  %v935_v15 = vadd.f32 %v2309_v40, %v919_v14 }
 0x10a   : > { %v1433_v7 = vpop.eup %1432  ;;  %v738_v57 = vadd.f32 %v1431_v53, %v722_v36  ;;  %1452 = vtanh.f32 %v934_v62  ;;  %v905_v34 = vmul.f32 %v1534_v29, %v2514_v60  ;;  %v2360_v36 = vld [vmem:[%s1789_s11 + $0x5] ss:$0 sm:$0xff]  ;;  %v655_v40 = vadd.f32 %v639_v47, %v2185_v8 }
 0x10b   : > { %v1435_v33 = vpop.eup %1434  ;;  %1454 = vtanh.f32 %v805_v32  ;;  %v532_v61 = vadd.f32 %v1433_v7, %v516_v35  ;;  %v920_v23 = vadd.f32 %v904_v30, %v1881_v22  ;;  %v772_v22 = vmul.f32 %v2360_v36, %v2029_v2  ;;  %v2516_v7 = vld [vmem:[#allocation10_spill] sm:$0xff] }
 0x10c   : > { %v1437_v0 = vpop.eup %1436  ;;  %1456 = vtanh.f32 %v738_v57  ;;  %v932_v38 = vadd.f32 %v1435_v33, %v2512_v48  ;;  %v921_v53 = vadd.f32 %v905_v34, %v1879_v21  ;;  %v775_v56 = vmul.f32 %v2360_v36, %v2072_v46 }
 0x10d   : > { %v1439_v18 = vpop.eup %1438  ;;  %v872_v9 = vadd.f32 %v1437_v0, %v2513_v42  ;;  %1458 = vtanh.f32 %v532_v61  ;;  %v936_v62 = vadd.f32 %v1427_v26, %v920_v23 }
 0x10e   : > { %v1441_v45 = vpop.eup %1440  ;;  %v668_v16 = vadd.f32 %v1439_v18, %v652_v58  ;;  %1460 = vtanh.f32 %v932_v38  ;;  %v937_v43 = vadd.f32 %v2329_v3, %v921_v53  ;;  %v2380_v3 = vld [vmem:[%s1789_s11 + $0x4] ss:$0 sm:$0xff]  ;;  %v2519_v53 = vmov 0.0|0.0  }
 0x10f   : > { %v1443_v6 = vpop.eup %1442  ;;  %1462 = vtanh.f32 %v872_v9  ;;  %v939_v25 = vadd.f32 %v1441_v45, %v2257_v41  ;;  %v788_v41 = vadd.f32 %v772_v22, %v2067_v4  ;;  %v791_v4 = vadd.f32 %v775_v56, %v2102_v31 }
 0x110   : > { %v1445_v11 = vpop.eup %1444  ;;  %v871_v59 = vadd.f32 %v1443_v6, %v2515_v20  ;;  %1464 = vtanh.f32 %v668_v16  ;;  %v705_v28 = vmul.f32 %v2380_v3, %v2100_v39  ;;  %v708_v9 = vmul.f32 %v2380_v3, %v2157_v1 }
 0x111   : > { %v1447_v19 = vpop.eup %1446  ;;  %1466 = vtanh.f32 %v935_v15  ;;  %v938_v32 = vadd.f32 %v1445_v11, %v2254_v51  ;;  %v569_v51 = vmul.f32 %v1872_v17, %v2174_v27  ;;  %v2518_v11 = vld [vmem:[#allocation17_spill] sm:$0xff] }
 0x112   : > { %v1449_v26 = vpop.eup %1448  ;;  %1468 = vtanh.f32 %v871_v59  ;;  %v671_v35 = vadd.f32 %v1447_v19, %v655_v40  ;;  %v721_v31 = vadd.f32 %v705_v28, %v2134_v5  ;;  %v724_v45 = vadd.f32 %v708_v9, %v2185_v8  ;;  %v1537_v59 = vld [vmem:[%s1789_s11 + $0x3] ss:$0 sm:$0xff] }
 0x113   : > { %v1451_v37 = vpop.eup %1450  ;;  %v933_v2 = vadd.f32 %v1449_v26, %v2516_v7  ;;  %1470 = vtanh.f32 %v936_v62  ;;  %v585_v14 = vadd.f32 %v569_v51, %v2211_v50  ;;  %v638_v22 = vmul.f32 %v1537_v59, %v2174_v27  ;;  %v969_v59 = vpop.permute.xlu0 %968 }
 0x114   : > { %v2372_v57 = vpop.eup %1452  ;;  %v804_v21 = vadd.f32 %v1451_v37, %v788_v41  ;;  %1472 = vtanh.f32 %v671_v35  ;;  %v774_v41 = vmul.f32 %v2360_v36, %v2100_v39  ;;  %v2520_v35 = vld [vmem:[#allocation18_spill] sm:$0xff]  ;;  %v777_v39 = vmul.f32 %v2360_v36, %v2157_v1 }
 0x115   : > { %v1455_v33 = vpop.eup %1454  ;;  %1474 = vtanh.f32 %v933_v2 }
 0x116   : > { %v1457_v61 = vpop.eup %1456  ;;  %v874_v46 = vadd.f32 %v1455_v33, %v2517_v54  ;;  %1476 = vtanh.f32 %v804_v21 }
 0x117   : > { %v1459_v29 = vpop.eup %1458  ;;  %v807_v30 = vadd.f32 %v1457_v61, %v791_v4  ;;  %1478 = vtanh.f32 %v937_v43  ;;  %v790_v43 = vadd.f32 %v774_v41, %v2134_v5  ;;  %v793_v61 = vadd.f32 %v777_v39, %v2185_v8 }
 0x118   : > { %v1461_v17 = vpop.eup %1460  ;;  %1480 = vtanh.f32 %v874_v46  ;;  %v601_v0 = vadd.f32 %v1459_v29, %v585_v14  ;;  %v707_v29 = vmul.f32 %v2380_v3, %v2174_v27  ;;  %v2521_v3 = vld [vmem:[#allocation19_spill] sm:$0xff] }
 0x119   : > { %v1463_v58 = vpop.eup %1462  ;;  %1482 = vtanh.f32 %v807_v30 }
 0x11a   : > { %v1465_v48 = vpop.eup %1464  ;;  %1484 = vtanh.f32 %v601_v0  ;;  %v941_v38 = vadd.f32 %v1463_v58, %v2264_v49  ;;  %v723_v8 = vadd.f32 %v707_v29, %v2211_v50 }
 0x11b   : > { %v1467_v18 = vpop.eup %1466  ;;  %v737_v42 = vadd.f32 %v1465_v48, %v721_v31  ;;  %1486 = vtanh.f32 %v938_v32 }
 0x11c   : > { %v1469_v15 = vpop.eup %1468  ;;  %1488 = vtanh.f32 %v939_v25  ;;  %v1209_v40 = vpack.c.bf16 %v1467_v18, %v2372_v57 }
 0x11d   : > { %v1471_v23 = vpop.eup %1470  ;;  %1490 = vtanh.f32 %v737_v42  ;;  %v940_v16 = vadd.f32 %v1469_v15, %v2261_v63  ;;  %v654_v63 = vadd.f32 %v638_v22, %v2211_v50  ;;  %v776_v42 = vmul.f32 %v2360_v36, %v2174_v27  ;;  %v2522_v36 = vld [vmem:[#allocation20_spill] sm:$0xff] }
 0x11e   : > { %v1473_v47 = vpop.eup %1472  ;;  %1492 = vtanh.f32 %v941_v38 }
 0x11f   : > { %v1475_v6 = vpop.eup %1474  ;;  %v740_v60 = vadd.f32 %v1473_v47, %v724_v45  ;;  %1494 = vtanh.f32 %v940_v16 }
 0x120   : > { %v1477_v49 = vpop.eup %1476  ;;  %v1206_v34 = vpack.c.bf16 %v1475_v6, %v1461_v17 }
 0x121   : > { %v1479_v62 = vpop.eup %1478  ;;  %v873_v20 = vadd.f32 %v1477_v49, %v2518_v11  ;;  %1496 = vtanh.f32 %v740_v60 }
 0x122   : > { %v1481_v25 = vpop.eup %1480  ;;  %1207 = vmatpush3.bf16.msra.mxu0 %v1206_v34  ;;  %v1212_v57 = vpack.c.bf16 %v1479_v62, %v1471_v23 }
 0x123   : > { %v1483_v19 = vpop.eup %1482  ;;  %1498 = vtanh.f32 %v873_v20  ;;  %1208 = vmatprep.subr.bf16.mxu0 %v2519_v53  ;;  %v943_v32 = vadd.f32 %v1481_v25, %v2280_v52 }
 0x124   : > { %v1485_v26 = vpop.eup %1484  ;;  %v876_v37 = vadd.f32 %v1483_v19, %v2520_v35 }
 0x125   : > { %v1487_v56 = vpop.eup %1486  ;;  %v670_v7 = vadd.f32 %v1485_v26, %v654_v63 }
 0x126   : > { %v1489_v2 = vpop.eup %1488  ;;  %1500 = vtanh.f32 %v876_v37  ;;  %1210 = vmatpush3.bf16.msra.mxu0 %v1209_v40 }
 0x127   : > { %v1491_v21 = vpop.eup %1490  ;;  %1502 = vtanh.f32 %v670_v7  ;;  %1211 = vmatprep.subr.bf16.mxu0 %v2519_v53  ;;  %v1215_v51 = vpack.c.bf16 %v1489_v2, %v1487_v56 }
 0x128   : > { %v1493_v52 = vpop.eup %1492  ;;  %v806_v33 = vadd.f32 %v1491_v21, %v790_v43 }
 0x129   : > { %v1495_v4 = vpop.eup %1494 }
 0x12a   : > { %1504 = vtanh.f32 %v806_v33  ;;  %1213 = vmatpush3.bf16.msra.mxu0 %v1212_v57  ;;  %v1218_v54 = vpack.c.bf16 %v1493_v52, %v1495_v4 }
 0x12b   : > { %v1497_v46 = vpop.eup %1496  ;;  %1214 = vmatprep.subr.bf16.mxu0 %v2519_v53  ;;  %1506 = vtanh.f32 %v943_v32 }
 0x12c   : > { %v809_v5 = vadd.f32 %v1497_v46, %v793_v61 }
 0x12d   : > { %v1499_v14 = vpop.eup %1498 }
 0x12e   : > { %1508 = vtanh.f32 %v809_v5  ;;  %1216 = vmatpush3.bf16.msra.mxu0 %v1215_v51  ;;  %v942_v28 = vadd.f32 %v1499_v14, %v2277_v44 }
 0x12f   : > { %1217 = vmatprep.subr.bf16.mxu0 %v2519_v53 }
 0x130   : > { %v1501_v1 = vpop.eup %1500  ;;  %1510 = vtanh.f32 %v942_v28 }
 0x131   : > { %v1503_v30 = vpop.eup %1502  ;;  %v945_v17 = vadd.f32 %v1501_v1, %v2287_v12  ;;  %v792_v12 = vadd.f32 %v776_v42, %v2211_v50 }
 0x132   : > { %v739_v0 = vadd.f32 %v1503_v30, %v723_v8  ;;  %1219 = vmatpush3.bf16.msra.mxu0 %v1218_v54 }
 0x133   : > { %1220 = vmatprep.subr.bf16.mxu0 %v2519_v53 }
 0x134   : > { %v1505_v58 = vpop.eup %1504  ;;  %1512 = vtanh.f32 %v739_v0 }
 0x135   : > { %v875_v31 = vadd.f32 %v1505_v58, %v2521_v3  ;;  %v1507_v48 = vpop.eup %1506 }
 0x137   : > { %1514 = vtanh.f32 %v875_v31 }
 0x138   : > { %v1509_v44 = vpop.eup %1508 }
 0x139   : > { %v878_v38 = vadd.f32 %v1509_v44, %v2197_v24 }
 0x13a   : > { %v1511_v18 = vpop.eup %1510 }
 0x13b   : > { %1516 = vtanh.f32 %v878_v38  ;;  %v1221_v9 = vpack.c.bf16 %v1507_v48, %v1511_v18 }
 0x13d   : > { %1222 = vmatpush3.bf16.msra.mxu0 %v1221_v9 }
 0x13e   : > { %v1513_v15 = vpop.eup %1512  ;;  %1223 = vmatprep.subr.bf16.mxu0 %v2519_v53 }
 0x13f   : > { %v808_v23 = vadd.f32 %v1513_v15, %v792_v12 }
 0x141   : > { %v1515_v45 = vpop.eup %1514  ;;  %1518 = vtanh.f32 %v808_v23 }
 0x142   : > { %v944_v16 = vadd.f32 %v1515_v45, %v2284_v55  ;;  %1520 = vtanh.f32 %v945_v17 }
 0x144   : > { %1522 = vtanh.f32 %v944_v16 }
 0x145   : > { %v1517_v24 = vpop.eup %1516 }
 0x146   : > { %v947_v47 = vadd.f32 %v1517_v24, %v2200_v13  ;;  %v964_v13 = vld [vmem:[%s2477_s3] sm:$0x3] }
 0x14b   : > { %v1519_v6 = vpop.eup %1518 }
 0x14c   : > { %v1521_v27 = vpop.eup %1520  ;;  %v877_v60 = vadd.f32 %v1519_v6, %v2522_v36 }
 0x14e   : > { %v1523_v49 = vpop.eup %1522  ;;  %1524 = vtanh.f32 %v877_v60 }
 0x14f   : > { %v1224_v50 = vpack.c.bf16 %v1521_v27, %v1523_v49  ;;  %1526 = vtanh.f32 %v947_v47 }
 0x151   : > { %1225 = vmatpush3.bf16.msra.mxu0 %v1224_v50 }
 0x152   : > { %1226 = vmatprep.subr.bf16.mxu0 %v2519_v53 }
 0x158   : > { %v1525_v34 = vpop.eup %1524 }
 0x159   : > { %v946_v62 = vadd.f32 %v1525_v34, %v2298_v10  ;;  %v1527_v55 = vpop.eup %1526 }
 0x15b   : > { %1528 = vtanh.f32 %v946_v62 }
 0x165   : > { %v1529_v11 = vpop.eup %1528 }
 0x166   : > { %v1227_v20 = vpack.c.bf16 %v1527_v55, %v1529_v11 }
 0x168   : > { %1228 = vmatpush3.bf16.msra.mxu0 %v1227_v20 }
 0x16b   : > { %1203 = vmatmul.mubr.f32.vlgmr.msra.gmra.mrb[0].mxu0 %v964_v13 }
 0x23e   : > { %v1037_v22 = vpop.f32.mrb[0].mxu0 }
 0x23f   : > { %v1038_v25 = vadd.f32 %v1037_v22, %v969_v59  ;;  %v1204_v40 = vpop.f32.mrb[1].mxu0 }
 0x241   : > { %v1042_v19 = vsel %vm1041_vm1, %v1038_v25, -inf }
 0x242   : > { %v1043_v63 = vrot.slane %v1042_v19, 4 }
 0x244   : > { %v1044_v53 = vmax.f32 %v1042_v19, %v1043_v63 }
 0x246   : > { %v1045_v10 = vrot.slane %v1044_v53, 2 }
 0x248   : > { %v1046_v32 = vmax.f32 %v1044_v53, %v1045_v10 }
 0x24a   : > { %v1047_v26 = vrot.slane %v1046_v32, 1 }
 0x24c   : > { %v1048_v41 = vmax.f32 %v1046_v32, %v1047_v26 }
 0x24e   : > { %v1049_v35 = vsub.f32 %v1038_v25, %v1048_v41 }
 0x250   : > { %v1050_v37 = vmul.f32 1.442695, %v1049_v35 }
 0x252   : > { %1530 = vpow2.f32 %v1050_v37 }
 0x25c   : > { %v1531_v56 = vpop.eup %1530 }
 0x25d   : > { %v1052_v7 = vsel %vm1041_vm1, %v1531_v56, 0.0 }
 0x25e   : > { %v1053_v2 = vrot.slane %v1052_v7, 4 }
 0x260   : > { %v1054_v43 = vadd.f32 %v1053_v2, %v1052_v7 }
 0x262   : > { %v1055_v57 = vrot.slane %v1054_v43, 2 }
 0x264   : > { %v1056_v21 = vadd.f32 %v1055_v57, %v1054_v43 }
 0x266   : > { %v1057_v51 = vrot.slane %v1056_v21, 1 }
 0x268   : > { %v1058_v52 = vadd.f32 %v1057_v51, %v1056_v21 }
 0x26a   : > { %1532 = vrcp.f32 %v1058_v52 }
 0x274   : > { %v1533_v33 = vpop.eup %1532 }
 0x275   : > { %v1060_v39 = vmul.f32 %v1533_v33, %v1531_v56 }
 0x277   : > { %1061 = vst [vmem:[%s215_s17] sm:$0x3] %v1060_v39 }
 0x278   : > { %1551 = shalt.err (!%p1548_p3)
}
 0x279   : > { %s1552_s10 = scalar_lea.hbm %s2432_s30, 32  ;;  %s1556_s13 = scalar_lea.hbm %s2479_s5, 96 }
 0x27a   : > { %p1553_p4 = scmp.ne.s32.totalorder %s2432_s30, %s1552_s10  ;;  %p1557_p9 = scmp.lt.u32.totalorder %s2432_s30, %s2479_s5 }
 0x27b   : > { %p1558_p10 = scmp.lt.u32.totalorder %s1556_s13, %s1552_s10  ;;  %p1560_p12 = scmp.lt.u32.totalorder %s1552_s10, %s2432_s30 }
 0x27c   : > { %p1554_p7 = pnand %p1553_p4, %p1675_p5 }
 0x27d   : > { %p1559_p11 = por %p1558_p10, %p1557_p9 }
 0x27e   : > { %p1555_p8 = pneg %p1554_p7 }
 0x27f   : > { %p1561_p13 = por %p1560_p12, %p1559_p11 }
 0x281   : > { %p1562_p0 = pnand %p1561_p13, %p1555_p8 }
 0x283   : > { %1565 = shalt.err (!%p1562_p0)
}
 0x284   : > { %1229 = dma.vmem_to_hbm [thread:$0]  (%p1675_p5), %s2434_s23, 32, %s2432_s30, %s1063_s6  }
 0x285 PF: > { %p1235_p1 = scmp.ge.s32.totalorder %s1600_s21, 2  ;;  %s1088_s16 = sand.u32 1, %s1588_s18  }
 0x286   : > { %s1089_s17 = scalar_lea.sflag [#allocation3], %s1088_s16 }
 0x287   : > { %p1232_p2 = pnand %p1235_p1, %p1679_p6 }
 0x289   : > { %1583 = dma.done.wait (!%p1232_p2), %s1089_s17, 32  }
 0x28a   : > { %1585 = vsyncadd (!%p1232_p2), %s1089_s17, 4294967264  ;;  %p15_p3 = scmp.ge.s32.totalorder %s1662_s24, 5   ;;  %s2523_s18 = smov %s1592_s19 }
 0x28b   : > { %s2524_s19 = smov %s1596_s20  ;;  %s2525_s20 = smov %s1673_s27 }
 0x28c   : > { %s2526_s21 = smov %s1662_s24  ;;  %17 = sbr.rel (!%p15_p3) target bundleno = 3 (0x3), region = 75 }
 0x293   :  { %1094 = vsyncpa [#allocation3], 1 }
 0x294   :  { %1096 = vsyncpa [#allocation3 + $0x1], 1 }

</bundles_post_ra>
